<compile_context>
chip_gen: v6e
topology: v6e:2x2x1
jax: 0.10.0
libtpu: 0.0.40
codegen_flags: <defaults>
</compile_context>

<pallas_src>
import numpy as np
import jax
import jax.numpy as jnp
from jax.experimental import pallas as pl
from jax.experimental.pallas import tpu as pltpu

NAN_VALUE = -1.0
ALPHA = 0.5
EPS = 1e-6
MAX_HEIGHT = 30
NUM_RANGES = MAX_HEIGHT + 1      # 30 unit ranges + [30, inf)
LANES = 128
TM_MAX = 1024                    # rows per block (<= ~1.5 MiB double-buffered)
NUM_CORES = 2                    # leading "parallel" grid dim (v7x megacore)


def _hist_kernel(t_ref, out_ref):
    """Accumulate per-lane cumulative range counts + total valid count.

    out_ref rows 0..NUM_RANGES-1 : count of pixels with expm1(target) >= r
    out_ref row  NUM_RANGES      : count of valid pixels (target != nan_value)
    """
    @pl.when(pl.program_id(1) == 0)
    def _():
        out_ref[...] = jnp.zeros_like(out_ref)

    t = t_ref[...]
    nat = jnp.exp(t) - 1.0          # expm1(target) in natural (meters) space
    # The nan_value sentinel (-1 -> nat ~= -0.632) fails every `nat >= r` test,
    # so no explicit `& valid` is needed for the range rows.
    for r in range(NUM_RANGES):
        m = (nat >= float(r)).astype(jnp.float32)
        out_ref[pl.ds(r, 1), :] += jnp.sum(m, axis=0, keepdims=True)
    valid = (t != NAN_VALUE).astype(jnp.float32)
    out_ref[pl.ds(NUM_RANGES, 1), :] += jnp.sum(valid, axis=0, keepdims=True)


def _weighted_l1_kernel(w_ref, p_ref, t_ref, out_ref):
    """Accumulate w[range(pixel)] * |pred - target| for valid pixels."""
    @pl.when(pl.program_id(1) == 0)
    def _():
        out_ref[...] = jnp.zeros_like(out_ref)

    p = p_ref[...]
    t = t_ref[...]
    nat = jnp.exp(t) - 1.0
    base = jnp.abs(p - t)

    # Monotone select chain: w ends up as the weight of the highest range whose
    # lower edge `nat` clears; nat < 0 (nan_value sentinel, padding, and valid
    # pixels below 0 m) keeps w = 0, matching the reference.
    w = jnp.zeros_like(base)
    for r in range(NUM_RANGES):
        w = jnp.where(nat >= float(r), w_ref[r], w)

    # Single validity guard so non-finite pred at invalid pixels cannot leak
    # NaNs into the sum (2 extra VPU ops per element, ~3% of this pass).
    out_ref[...] += jnp.where(t != NAN_VALUE, w * base, 0.0)


def _round_up(x, m):
    return ((x + m - 1) // m) * m


def _cdiv(a, b):
    return -(-a // b)


def frequency_balanced_l1_loss(pred, target):
    """Frequency-balanced L1 loss (weights=True, mask=None path)."""
    # TODO(synk): the optional external `mask` argument of the PyTorch forward
    # is not plumbed through (only the default target != nan_value path).
    assert pred.shape == target.shape
    n = int(np.prod(pred.shape))
    rows = _cdiv(n, LANES)

    # Adaptive tiling: as few grid steps as possible, block height a multiple
    # of 8 and capped at TM_MAX, split 2-ways for the leading parallel axis.
    inner = max(1, _cdiv(rows, NUM_CORES * TM_MAX))      # grid steps per core
    tm = _round_up(_cdiv(rows, NUM_CORES * inner), 8)    # rows per block
    rows_padded = _round_up(rows, NUM_CORES * tm)
    inner = rows_padded // (NUM_CORES * tm)
    pad = rows_padded * LANES - n

    p_flat = pred.reshape(-1).astype(jnp.float32)
    t_flat = target.reshape(-1).astype(jnp.float32)
    if pad:
        # Only taken when the flattened size does not tile evenly; padded
        # pixels carry the nan_value sentinel so they are masked everywhere.
        fill = jnp.full((pad,), NAN_VALUE, jnp.float32)
        p_flat = jnp.concatenate([p_flat, fill])
        t_flat = jnp.concatenate([t_flat, fill])
    p2 = p_flat.reshape(rows_padded, LANES)
    t2 = t_flat.reshape(rows_padded, LANES)

    grid = (NUM_CORES, inner)
    data_spec = pl.BlockSpec((tm, LANES), lambda c, i: (c * inner + i, 0))
    tpu_params = pltpu.CompilerParams(
        dimension_semantics=("parallel", "arbitrary"))

    # ---- Pass 1: cumulative range histogram + valid count -------------------
    hist = pl.pallas_call(
        _hist_kernel,
        out_shape=jax.ShapeDtypeStruct(
            (NUM_CORES * (NUM_RANGES + 1), LANES), jnp.float32),
        grid=grid,
        in_specs=[data_spec],
        out_specs=pl.BlockSpec((NUM_RANGES + 1, LANES), lambda c, i: (c, 0)),
        compiler_params=tpu_params,
    )(t2)

    counts = jnp.sum(
        hist.reshape(NUM_CORES, NUM_RANGES + 1, LANES), axis=(0, 2))
    cum = counts[:NUM_RANGES]            # cum[r] = #{valid & expm1(t) >= r}
    total_valid = counts[NUM_RANGES]
    bin_counts = cum - jnp.concatenate([cum[1:], jnp.zeros((1,), jnp.float32)])
    safe_total = jnp.maximum(total_valid, 1.0)
    freqs = bin_counts / safe_total
    wtable = (1.0 / (freqs ** ALPHA + EPS)).astype(jnp.float32)  # (NUM_RANGES,)

    # ---- Pass 2: weighted masked L1 ------------------------------------------
    partial = pl.pallas_call(
        _weighted_l1_kernel,
        out_shape=jax.ShapeDtypeStruct((NUM_CORES * tm, LANES), jnp.float32),
        grid=grid,
        in_specs=[
            pl.BlockSpec(memory_space=pltpu.MemorySpace.SMEM),   # weight table
            data_spec,                                           # pred
            data_spec,                                           # target
        ],
        out_specs=pl.BlockSpec((tm, LANES), lambda c, i: (c, 0)),
        compiler_params=tpu_params,
    )(wtable, p2, t2)

    numer = jnp.sum(partial)
    return jnp.where(total_valid > 0, numer / total_valid, jnp.float32(0.0))


def _ref_loss_numpy(pred, target):
    """Pure numpy re-implementation of the PyTorch forward (weights=True)."""
    pred = np.asarray(pred, np.float32)
    target = np.asarray(target, np.float32)
    valid = target != NAN_VALUE
    total = int(valid.sum())
    if total == 0:
        return 0.0
    nat_all = np.exp(target) - 1.0
    ranges = [(float(i), float(i + 1)) for i in range(MAX_HEIGHT)]
    ranges.append((float(MAX_HEIGHT), np.inf))
    freqs = {}
    for i, (lo, hi) in enumerate(ranges):
        if np.isinf(hi):
            m = (nat_all >= lo) & valid
        else:
            m = (nat_all >= lo) & (nat_all < hi) & valid
        freqs[i] = m.sum() / total
    weights = {i: 1.0 / (f ** ALPHA + EPS) for i, f in freqs.items()}
    vp = pred[valid].astype(np.float64)
    vt = target[valid].astype(np.float64)
    base = np.abs(vp - vt)
    natv = np.exp(target[valid]) - 1.0
    wl = np.zeros_like(base)
    for i, (lo, hi) in enumerate(ranges):
        if np.isinf(hi):
            m = natv >= lo
        else:
            m = (natv >= lo) & (natv < hi)
        if m.any():
            wl[m] = base[m] * weights[i]
    return float(wl.mean())


if __name__ == "__main__":
    shapes = [
        (2, 4, 16, 16),    # aligned, no padding, tm=8, grid (2, 1)
        (3, 5, 37),        # ragged -> exercises nan_value padding path
        (2, 3, 256, 256),  # larger -> tm=768, grid (2, 2) accumulation path
    ]
    key = jax.random.PRNGKey(0)
    for shape in shapes:
        key, k1, k2, k3 = jax.random.split(key, 4)
        heights = jax.random.uniform(k1, shape, jnp.float32, 0.0, 40.0)
        target = jnp.log1p(heights)                                   # log1p space
        invalid = jax.random.uniform(k2, shape) < 0.2
        target = jnp.where(invalid, jnp.float32(NAN_VALUE), target)   # no-data px
        pred = target + 0.1 * jax.random.normal(k3, shape, jnp.float32)

        loss = jax.block_until_ready(frequency_balanced_l1_loss(pred, target))
        ref = _ref_loss_numpy(np.asarray(pred), np.asarray(target))
        assert np.allclose(float(loss), ref, rtol=2e-3, atol=1e-5), (
            shape, float(loss), ref)
    print("KERNEL_OK")
</pallas_src>

<mosaic_0001>
module attributes {stable_mosaic.version = 11 : i64} {
  func.func @_hist_kernel(%arg0: i32, %arg1: i32, %arg2: memref<8x128xf32, #tpu.memory_space<vmem>>, %arg3: memref<32x128xf32, #tpu.memory_space<vmem>>) attributes {dimension_semantics = [#tpu.dimension_semantics<parallel>, #tpu.dimension_semantics<arbitrary>], iteration_bounds = array<i64: 2, 1>, scalar_prefetch = 0 : i64, scratch_operands = 0 : i64, tpu.core_type = #tpu.core_type<tc>, window_params = [{transform_indices = @transform_0, window_bounds = array<i64: 8, 128>}, {transform_indices = @transform_1, window_bounds = array<i64: 32, 128>}]} {
    %c0_i32 = arith.constant 0 : i32
    %0 = arith.cmpi eq, %arg1, %c0_i32 : i32
    %1 = arith.extui %0 : i1 to i32
    %c0_i32_0 = arith.constant 0 : i32
    %2 = arith.cmpi ne, %1, %c0_i32_0 : i32
    scf.if %2 {
      %cst_163 = arith.constant 0.000000e+00 : f32
      %295 = vector.broadcast %cst_163 : f32 to vector<32x128xf32>
      %c0_164 = arith.constant 0 : index
      %c0_165 = arith.constant 0 : index
      %296 = vector.load %arg3[%c0_164, %c0_165] : memref<32x128xf32, #tpu.memory_space<vmem>>, vector<32x128xf32>
      tpu.vector_store %arg3[%c0_164, %c0_165], %295 {strides = array<i32>} : memref<32x128xf32, #tpu.memory_space<vmem>>, vector<32x128xf32>,
    } else {
    }
    %c0 = arith.constant 0 : index
    %c0_1 = arith.constant 0 : index
    %3 = vector.load %arg2[%c0, %c0_1] : memref<8x128xf32, #tpu.memory_space<vmem>>, vector<8x128xf32>
    %4 = math.exp %3 : vector<8x128xf32>
    %cst = arith.constant 1.000000e+00 : f32
    %5 = vector.broadcast %cst : f32 to vector<8x128xf32>
    %6 = arith.subf %4, %5 : vector<8x128xf32>
    %cst_2 = arith.constant 0.000000e+00 : f32
    %7 = vector.broadcast %cst_2 : f32 to vector<8x128xf32>
    %8 = arith.cmpf oge, %6, %7 : vector<8x128xf32>
    %9 = arith.extui %8 : vector<8x128xi1> to vector<8x128xi32>
    %10 = arith.sitofp %9 : vector<8x128xi32> to vector<8x128xf32>
    %c0_3 = arith.constant 0 : index
    %c0_4 = arith.constant 0 : index
    %11 = vector.load %arg3[%c0_3, %c0_4] : memref<32x128xf32, #tpu.memory_space<vmem>>, vector<1x128xf32>
    %cst_5 = arith.constant dense<0.000000e+00> : vector<128xf32>
    %12 = vector.multi_reduction <add>, %10, %cst_5 [0] : vector<8x128xf32> to vector<128xf32>
    %13 = vector.shape_cast %12 : vector<128xf32> to vector<1x128xf32>
    %14 = arith.addf %11, %13 : vector<1x128xf32>
    %c0_6 = arith.constant 0 : index
    %c0_7 = arith.constant 0 : index
    %15 = vector.load %arg3[%c0_6, %c0_7] : memref<32x128xf32, #tpu.memory_space<vmem>>, vector<1x128xf32>
    tpu.vector_store %arg3[%c0_6, %c0_7], %14 {strides = array<i32>} : memref<32x128xf32, #tpu.memory_space<vmem>>, vector<1x128xf32>,
    %cst_8 = arith.constant 1.000000e+00 : f32
    %16 = vector.broadcast %cst_8 : f32 to vector<8x128xf32>
    %17 = arith.cmpf oge, %6, %16 : vector<8x128xf32>
    %18 = arith.extui %17 : vector<8x128xi1> to vector<8x128xi32>
    %19 = arith.sitofp %18 : vector<8x128xi32> to vector<8x128xf32>
    %c1 = arith.constant 1 : index
    %c0_9 = arith.constant 0 : index
    %20 = vector.load %arg3[%c1, %c0_9] : memref<32x128xf32, #tpu.memory_space<vmem>>, vector<1x128xf32>
    %cst_10 = arith.constant dense<0.000000e+00> : vector<128xf32>
    %21 = vector.multi_reduction <add>, %19, %cst_10 [0] : vector<8x128xf32> to vector<128xf32>
    %22 = vector.shape_cast %21 : vector<128xf32> to vector<1x128xf32>
    %23 = arith.addf %20, %22 : vector<1x128xf32>
    %c1_11 = arith.constant 1 : index
    %c0_12 = arith.constant 0 : index
    %24 = vector.load %arg3[%c1_11, %c0_12] : memref<32x128xf32, #tpu.memory_space<vmem>>, vector<1x128xf32>
    tpu.vector_store %arg3[%c1_11, %c0_12], %23 {strides = array<i32>} : memref<32x128xf32, #tpu.memory_space<vmem>>, vector<1x128xf32>,
    %cst_13 = arith.constant 2.000000e+00 : f32
    %25 = vector.broadcast %cst_13 : f32 to vector<8x128xf32>
    %26 = arith.cmpf oge, %6, %25 : vector<8x128xf32>
    %27 = arith.extui %26 : vector<8x128xi1> to vector<8x128xi32>
    %28 = arith.sitofp %27 : vector<8x128xi32> to vector<8x128xf32>
    %c2 = arith.constant 2 : index
    %c0_14 = arith.constant 0 : index
    %29 = vector.load %arg3[%c2, %c0_14] : memref<32x128xf32, #tpu.memory_space<vmem>>, vector<1x128xf32>
    %cst_15 = arith.constant dense<0.000000e+00> : vector<128xf32>
    %30 = vector.multi_reduction <add>, %28, %cst_15 [0] : vector<8x128xf32> to vector<128xf32>
    %31 = vector.shape_cast %30 : vector<128xf32> to vector<1x128xf32>
    %32 = arith.addf %29, %31 : vector<1x128xf32>
    %c2_16 = arith.constant 2 : index
    %c0_17 = arith.constant 0 : index
    %33 = vector.load %arg3[%c2_16, %c0_17] : memref<32x128xf32, #tpu.memory_space<vmem>>, vector<1x128xf32>
    tpu.vector_store %arg3[%c2_16, %c0_17], %32 {strides = array<i32>} : memref<32x128xf32, #tpu.memory_space<vmem>>, vector<1x128xf32>,
    %cst_18 = arith.constant 3.000000e+00 : f32
    %34 = vector.broadcast %cst_18 : f32 to vector<8x128xf32>
    %35 = arith.cmpf oge, %6, %34 : vector<8x128xf32>
    %36 = arith.extui %35 : vector<8x128xi1> to vector<8x128xi32>
    %37 = arith.sitofp %36 : vector<8x128xi32> to vector<8x128xf32>
    %c3 = arith.constant 3 : index
    %c0_19 = arith.constant 0 : index
    %38 = vector.load %arg3[%c3, %c0_19] : memref<32x128xf32, #tpu.memory_space<vmem>>, vector<1x128xf32>
    %cst_20 = arith.constant dense<0.000000e+00> : vector<128xf32>
    %39 = vector.multi_reduction <add>, %37, %cst_20 [0] : vector<8x128xf32> to vector<128xf32>
    %40 = vector.shape_cast %39 : vector<128xf32> to vector<1x128xf32>
    %41 = arith.addf %38, %40 : vector<1x128xf32>
    %c3_21 = arith.constant 3 : index
    %c0_22 = arith.constant 0 : index
    %42 = vector.load %arg3[%c3_21, %c0_22] : memref<32x128xf32, #tpu.memory_space<vmem>>, vector<1x128xf32>
    tpu.vector_store %arg3[%c3_21, %c0_22], %41 {strides = array<i32>} : memref<32x128xf32, #tpu.memory_space<vmem>>, vector<1x128xf32>,
    %cst_23 = arith.constant 4.000000e+00 : f32
    %43 = vector.broadcast %cst_23 : f32 to vector<8x128xf32>
    %44 = arith.cmpf oge, %6, %43 : vector<8x128xf32>
    %45 = arith.extui %44 : vector<8x128xi1> to vector<8x128xi32>
    %46 = arith.sitofp %45 : vector<8x128xi32> to vector<8x128xf32>
    %c4 = arith.constant 4 : index
    %c0_24 = arith.constant 0 : index
    %47 = vector.load %arg3[%c4, %c0_24] : memref<32x128xf32, #tpu.memory_space<vmem>>, vector<1x128xf32>
    %cst_25 = arith.constant dense<0.000000e+00> : vector<128xf32>
    %48 = vector.multi_reduction <add>, %46, %cst_25 [0] : vector<8x128xf32> to vector<128xf32>
    %49 = vector.shape_cast %48 : vector<128xf32> to vector<1x128xf32>
    %50 = arith.addf %47, %49 : vector<1x128xf32>
    %c4_26 = arith.constant 4 : index
    %c0_27 = arith.constant 0 : index
    %51 = vector.load %arg3[%c4_26, %c0_27] : memref<32x128xf32, #tpu.memory_space<vmem>>, vector<1x128xf32>
    tpu.vector_store %arg3[%c4_26, %c0_27], %50 {strides = array<i32>} : memref<32x128xf32, #tpu.memory_space<vmem>>, vector<1x128xf32>,
    %cst_28 = arith.constant 5.000000e+00 : f32
    %52 = vector.broadcast %cst_28 : f32 to vector<8x128xf32>
    %53 = arith.cmpf oge, %6, %52 : vector<8x128xf32>
    %54 = arith.extui %53 : vector<8x128xi1> to vector<8x128xi32>
    %55 = arith.sitofp %54 : vector<8x128xi32> to vector<8x128xf32>
    %c5 = arith.constant 5 : index
    %c0_29 = arith.constant 0 : index
    %56 = vector.load %arg3[%c5, %c0_29] : memref<32x128xf32, #tpu.memory_space<vmem>>, vector<1x128xf32>
    %cst_30 = arith.constant dense<0.000000e+00> : vector<128xf32>
    %57 = vector.multi_reduction <add>, %55, %cst_30 [0] : vector<8x128xf32> to vector<128xf32>
    %58 = vector.shape_cast %57 : vector<128xf32> to vector<1x128xf32>
    %59 = arith.addf %56, %58 : vector<1x128xf32>
    %c5_31 = arith.constant 5 : index
    %c0_32 = arith.constant 0 : index
    %60 = vector.load %arg3[%c5_31, %c0_32] : memref<32x128xf32, #tpu.memory_space<vmem>>, vector<1x128xf32>
    tpu.vector_store %arg3[%c5_31, %c0_32], %59 {strides = array<i32>} : memref<32x128xf32, #tpu.memory_space<vmem>>, vector<1x128xf32>,
    %cst_33 = arith.constant 6.000000e+00 : f32
    %61 = vector.broadcast %cst_33 : f32 to vector<8x128xf32>
    %62 = arith.cmpf oge, %6, %61 : vector<8x128xf32>
    %63 = arith.extui %62 : vector<8x128xi1> to vector<8x128xi32>
    %64 = arith.sitofp %63 : vector<8x128xi32> to vector<8x128xf32>
    %c6 = arith.constant 6 : index
    %c0_34 = arith.constant 0 : index
    %65 = vector.load %arg3[%c6, %c0_34] : memref<32x128xf32, #tpu.memory_space<vmem>>, vector<1x128xf32>
    %cst_35 = arith.constant dense<0.000000e+00> : vector<128xf32>
    %66 = vector.multi_reduction <add>, %64, %cst_35 [0] : vector<8x128xf32> to vector<128xf32>
    %67 = vector.shape_cast %66 : vector<128xf32> to vector<1x128xf32>
    %68 = arith.addf %65, %67 : vector<1x128xf32>
    %c6_36 = arith.constant 6 : index
    %c0_37 = arith.constant 0 : index
    %69 = vector.load %arg3[%c6_36, %c0_37] : memref<32x128xf32, #tpu.memory_space<vmem>>, vector<1x128xf32>
    tpu.vector_store %arg3[%c6_36, %c0_37], %68 {strides = array<i32>} : memref<32x128xf32, #tpu.memory_space<vmem>>, vector<1x128xf32>,
    %cst_38 = arith.constant 7.000000e+00 : f32
    %70 = vector.broadcast %cst_38 : f32 to vector<8x128xf32>
    %71 = arith.cmpf oge, %6, %70 : vector<8x128xf32>
    %72 = arith.extui %71 : vector<8x128xi1> to vector<8x128xi32>
    %73 = arith.sitofp %72 : vector<8x128xi32> to vector<8x128xf32>
    %c7 = arith.constant 7 : index
    %c0_39 = arith.constant 0 : index
    %74 = vector.load %arg3[%c7, %c0_39] : memref<32x128xf32, #tpu.memory_space<vmem>>, vector<1x128xf32>
    %cst_40 = arith.constant dense<0.000000e+00> : vector<128xf32>
    %75 = vector.multi_reduction <add>, %73, %cst_40 [0] : vector<8x128xf32> to vector<128xf32>
    %76 = vector.shape_cast %75 : vector<128xf32> to vector<1x128xf32>
    %77 = arith.addf %74, %76 : vector<1x128xf32>
    %c7_41 = arith.constant 7 : index
    %c0_42 = arith.constant 0 : index
    %78 = vector.load %arg3[%c7_41, %c0_42] : memref<32x128xf32, #tpu.memory_space<vmem>>, vector<1x128xf32>
    tpu.vector_store %arg3[%c7_41, %c0_42], %77 {strides = array<i32>} : memref<32x128xf32, #tpu.memory_space<vmem>>, vector<1x128xf32>,
    %cst_43 = arith.constant 8.000000e+00 : f32
    %79 = vector.broadcast %cst_43 : f32 to vector<8x128xf32>
    %80 = arith.cmpf oge, %6, %79 : vector<8x128xf32>
    %81 = arith.extui %80 : vector<8x128xi1> to vector<8x128xi32>
    %82 = arith.sitofp %81 : vector<8x128xi32> to vector<8x128xf32>
    %c8 = arith.constant 8 : index
    %c0_44 = arith.constant 0 : index
    %83 = vector.load %arg3[%c8, %c0_44] : memref<32x128xf32, #tpu.memory_space<vmem>>, vector<1x128xf32>
    %cst_45 = arith.constant dense<0.000000e+00> : vector<128xf32>
    %84 = vector.multi_reduction <add>, %82, %cst_45 [0] : vector<8x128xf32> to vector<128xf32>
    %85 = vector.shape_cast %84 : vector<128xf32> to vector<1x128xf32>
    %86 = arith.addf %83, %85 : vector<1x128xf32>
    %c8_46 = arith.constant 8 : index
    %c0_47 = arith.constant 0 : index
    %87 = vector.load %arg3[%c8_46, %c0_47] : memref<32x128xf32, #tpu.memory_space<vmem>>, vector<1x128xf32>
    tpu.vector_store %arg3[%c8_46, %c0_47], %86 {strides = array<i32>} : memref<32x128xf32, #tpu.memory_space<vmem>>, vector<1x128xf32>,
    %cst_48 = arith.constant 9.000000e+00 : f32
    %88 = vector.broadcast %cst_48 : f32 to vector<8x128xf32>
    %89 = arith.cmpf oge, %6, %88 : vector<8x128xf32>
    %90 = arith.extui %89 : vector<8x128xi1> to vector<8x128xi32>
    %91 = arith.sitofp %90 : vector<8x128xi32> to vector<8x128xf32>
    %c9 = arith.constant 9 : index
    %c0_49 = arith.constant 0 : index
    %92 = vector.load %arg3[%c9, %c0_49] : memref<32x128xf32, #tpu.memory_space<vmem>>, vector<1x128xf32>
    %cst_50 = arith.constant dense<0.000000e+00> : vector<128xf32>
    %93 = vector.multi_reduction <add>, %91, %cst_50 [0] : vector<8x128xf32> to vector<128xf32>
    %94 = vector.shape_cast %93 : vector<128xf32> to vector<1x128xf32>
    %95 = arith.addf %92, %94 : vector<1x128xf32>
    %c9_51 = arith.constant 9 : index
    %c0_52 = arith.constant 0 : index
    %96 = vector.load %arg3[%c9_51, %c0_52] : memref<32x128xf32, #tpu.memory_space<vmem>>, vector<1x128xf32>
    tpu.vector_store %arg3[%c9_51, %c0_52], %95 {strides = array<i32>} : memref<32x128xf32, #tpu.memory_space<vmem>>, vector<1x128xf32>,
    %cst_53 = arith.constant 1.000000e+01 : f32
    %97 = vector.broadcast %cst_53 : f32 to vector<8x128xf32>
    %98 = arith.cmpf oge, %6, %97 : vector<8x128xf32>
    %99 = arith.extui %98 : vector<8x128xi1> to vector<8x128xi32>
    %100 = arith.sitofp %99 : vector<8x128xi32> to vector<8x128xf32>
    %c10 = arith.constant 10 : index
    %c0_54 = arith.constant 0 : index
    %101 = vector.load %arg3[%c10, %c0_54] : memref<32x128xf32, #tpu.memory_space<vmem>>, vector<1x128xf32>
    %cst_55 = arith.constant dense<0.000000e+00> : vector<128xf32>
    %102 = vector.multi_reduction <add>, %100, %cst_55 [0] : vector<8x128xf32> to vector<128xf32>
    %103 = vector.shape_cast %102 : vector<128xf32> to vector<1x128xf32>
    %104 = arith.addf %101, %103 : vector<1x128xf32>
    %c10_56 = arith.constant 10 : index
    %c0_57 = arith.constant 0 : index
    %105 = vector.load %arg3[%c10_56, %c0_57] : memref<32x128xf32, #tpu.memory_space<vmem>>, vector<1x128xf32>
    tpu.vector_store %arg3[%c10_56, %c0_57], %104 {strides = array<i32>} : memref<32x128xf32, #tpu.memory_space<vmem>>, vector<1x128xf32>,
    %cst_58 = arith.constant 1.100000e+01 : f32
    %106 = vector.broadcast %cst_58 : f32 to vector<8x128xf32>
    %107 = arith.cmpf oge, %6, %106 : vector<8x128xf32>
    %108 = arith.extui %107 : vector<8x128xi1> to vector<8x128xi32>
    %109 = arith.sitofp %108 : vector<8x128xi32> to vector<8x128xf32>
    %c11 = arith.constant 11 : index
    %c0_59 = arith.constant 0 : index
    %110 = vector.load %arg3[%c11, %c0_59] : memref<32x128xf32, #tpu.memory_space<vmem>>, vector<1x128xf32>
    %cst_60 = arith.constant dense<0.000000e+00> : vector<128xf32>
    %111 = vector.multi_reduction <add>, %109, %cst_60 [0] : vector<8x128xf32> to vector<128xf32>
    %112 = vector.shape_cast %111 : vector<128xf32> to vector<1x128xf32>
    %113 = arith.addf %110, %112 : vector<1x128xf32>
    %c11_61 = arith.constant 11 : index
    %c0_62 = arith.constant 0 : index
    %114 = vector.load %arg3[%c11_61, %c0_62] : memref<32x128xf32, #tpu.memory_space<vmem>>, vector<1x128xf32>
    tpu.vector_store %arg3[%c11_61, %c0_62], %113 {strides = array<i32>} : memref<32x128xf32, #tpu.memory_space<vmem>>, vector<1x128xf32>,
    %cst_63 = arith.constant 1.200000e+01 : f32
    %115 = vector.broadcast %cst_63 : f32 to vector<8x128xf32>
    %116 = arith.cmpf oge, %6, %115 : vector<8x128xf32>
    %117 = arith.extui %116 : vector<8x128xi1> to vector<8x128xi32>
    %118 = arith.sitofp %117 : vector<8x128xi32> to vector<8x128xf32>
    %c12 = arith.constant 12 : index
    %c0_64 = arith.constant 0 : index
    %119 = vector.load %arg3[%c12, %c0_64] : memref<32x128xf32, #tpu.memory_space<vmem>>, vector<1x128xf32>
    %cst_65 = arith.constant dense<0.000000e+00> : vector<128xf32>
    %120 = vector.multi_reduction <add>, %118, %cst_65 [0] : vector<8x128xf32> to vector<128xf32>
    %121 = vector.shape_cast %120 : vector<128xf32> to vector<1x128xf32>
    %122 = arith.addf %119, %121 : vector<1x128xf32>
    %c12_66 = arith.constant 12 : index
    %c0_67 = arith.constant 0 : index
    %123 = vector.load %arg3[%c12_66, %c0_67] : memref<32x128xf32, #tpu.memory_space<vmem>>, vector<1x128xf32>
    tpu.vector_store %arg3[%c12_66, %c0_67], %122 {strides = array<i32>} : memref<32x128xf32, #tpu.memory_space<vmem>>, vector<1x128xf32>,
    %cst_68 = arith.constant 1.300000e+01 : f32
    %124 = vector.broadcast %cst_68 : f32 to vector<8x128xf32>
    %125 = arith.cmpf oge, %6, %124 : vector<8x128xf32>
    %126 = arith.extui %125 : vector<8x128xi1> to vector<8x128xi32>
    %127 = arith.sitofp %126 : vector<8x128xi32> to vector<8x128xf32>
    %c13 = arith.constant 13 : index
    %c0_69 = arith.constant 0 : index
    %128 = vector.load %arg3[%c13, %c0_69] : memref<32x128xf32, #tpu.memory_space<vmem>>, vector<1x128xf32>
    %cst_70 = arith.constant dense<0.000000e+00> : vector<128xf32>
    %129 = vector.multi_reduction <add>, %127, %cst_70 [0] : vector<8x128xf32> to vector<128xf32>
    %130 = vector.shape_cast %129 : vector<128xf32> to vector<1x128xf32>
    %131 = arith.addf %128, %130 : vector<1x128xf32>
    %c13_71 = arith.constant 13 : index
    %c0_72 = arith.constant 0 : index
    %132 = vector.load %arg3[%c13_71, %c0_72] : memref<32x128xf32, #tpu.memory_space<vmem>>, vector<1x128xf32>
    tpu.vector_store %arg3[%c13_71, %c0_72], %131 {strides = array<i32>} : memref<32x128xf32, #tpu.memory_space<vmem>>, vector<1x128xf32>,
    %cst_73 = arith.constant 1.400000e+01 : f32
    %133 = vector.broadcast %cst_73 : f32 to vector<8x128xf32>
    %134 = arith.cmpf oge, %6, %133 : vector<8x128xf32>
    %135 = arith.extui %134 : vector<8x128xi1> to vector<8x128xi32>
    %136 = arith.sitofp %135 : vector<8x128xi32> to vector<8x128xf32>
    %c14 = arith.constant 14 : index
    %c0_74 = arith.constant 0 : index
    %137 = vector.load %arg3[%c14, %c0_74] : memref<32x128xf32, #tpu.memory_space<vmem>>, vector<1x128xf32>
    %cst_75 = arith.constant dense<0.000000e+00> : vector<128xf32>
    %138 = vector.multi_reduction <add>, %136, %cst_75 [0] : vector<8x128xf32> to vector<128xf32>
    %139 = vector.shape_cast %138 : vector<128xf32> to vector<1x128xf32>
    %140 = arith.addf %137, %139 : vector<1x128xf32>
    %c14_76 = arith.constant 14 : index
    %c0_77 = arith.constant 0 : index
    %141 = vector.load %arg3[%c14_76, %c0_77] : memref<32x128xf32, #tpu.memory_space<vmem>>, vector<1x128xf32>
    tpu.vector_store %arg3[%c14_76, %c0_77], %140 {strides = array<i32>} : memref<32x128xf32, #tpu.memory_space<vmem>>, vector<1x128xf32>,
    %cst_78 = arith.constant 1.500000e+01 : f32
    %142 = vector.broadcast %cst_78 : f32 to vector<8x128xf32>
    %143 = arith.cmpf oge, %6, %142 : vector<8x128xf32>
    %144 = arith.extui %143 : vector<8x128xi1> to vector<8x128xi32>
    %145 = arith.sitofp %144 : vector<8x128xi32> to vector<8x128xf32>
    %c15 = arith.constant 15 : index
    %c0_79 = arith.constant 0 : index
    %146 = vector.load %arg3[%c15, %c0_79] : memref<32x128xf32, #tpu.memory_space<vmem>>, vector<1x128xf32>
    %cst_80 = arith.constant dense<0.000000e+00> : vector<128xf32>
    %147 = vector.multi_reduction <add>, %145, %cst_80 [0] : vector<8x128xf32> to vector<128xf32>
    %148 = vector.shape_cast %147 : vector<128xf32> to vector<1x128xf32>
    %149 = arith.addf %146, %148 : vector<1x128xf32>
    %c15_81 = arith.constant 15 : index
    %c0_82 = arith.constant 0 : index
    %150 = vector.load %arg3[%c15_81, %c0_82] : memref<32x128xf32, #tpu.memory_space<vmem>>, vector<1x128xf32>
    tpu.vector_store %arg3[%c15_81, %c0_82], %149 {strides = array<i32>} : memref<32x128xf32, #tpu.memory_space<vmem>>, vector<1x128xf32>,
    %cst_83 = arith.constant 1.600000e+01 : f32
    %151 = vector.broadcast %cst_83 : f32 to vector<8x128xf32>
    %152 = arith.cmpf oge, %6, %151 : vector<8x128xf32>
    %153 = arith.extui %152 : vector<8x128xi1> to vector<8x128xi32>
    %154 = arith.sitofp %153 : vector<8x128xi32> to vector<8x128xf32>
    %c16 = arith.constant 16 : index
    %c0_84 = arith.constant 0 : index
    %155 = vector.load %arg3[%c16, %c0_84] : memref<32x128xf32, #tpu.memory_space<vmem>>, vector<1x128xf32>
    %cst_85 = arith.constant dense<0.000000e+00> : vector<128xf32>
    %156 = vector.multi_reduction <add>, %154, %cst_85 [0] : vector<8x128xf32> to vector<128xf32>
    %157 = vector.shape_cast %156 : vector<128xf32> to vector<1x128xf32>
    %158 = arith.addf %155, %157 : vector<1x128xf32>
    %c16_86 = arith.constant 16 : index
    %c0_87 = arith.constant 0 : index
    %159 = vector.load %arg3[%c16_86, %c0_87] : memref<32x128xf32, #tpu.memory_space<vmem>>, vector<1x128xf32>
    tpu.vector_store %arg3[%c16_86, %c0_87], %158 {strides = array<i32>} : memref<32x128xf32, #tpu.memory_space<vmem>>, vector<1x128xf32>,
    %cst_88 = arith.constant 1.700000e+01 : f32
    %160 = vector.broadcast %cst_88 : f32 to vector<8x128xf32>
    %161 = arith.cmpf oge, %6, %160 : vector<8x128xf32>
    %162 = arith.extui %161 : vector<8x128xi1> to vector<8x128xi32>
    %163 = arith.sitofp %162 : vector<8x128xi32> to vector<8x128xf32>
    %c17 = arith.constant 17 : index
    %c0_89 = arith.constant 0 : index
    %164 = vector.load %arg3[%c17, %c0_89] : memref<32x128xf32, #tpu.memory_space<vmem>>, vector<1x128xf32>
    %cst_90 = arith.constant dense<0.000000e+00> : vector<128xf32>
    %165 = vector.multi_reduction <add>, %163, %cst_90 [0] : vector<8x128xf32> to vector<128xf32>
    %166 = vector.shape_cast %165 : vector<128xf32> to vector<1x128xf32>
    %167 = arith.addf %164, %166 : vector<1x128xf32>
    %c17_91 = arith.constant 17 : index
    %c0_92 = arith.constant 0 : index
    %168 = vector.load %arg3[%c17_91, %c0_92] : memref<32x128xf32, #tpu.memory_space<vmem>>, vector<1x128xf32>
    tpu.vector_store %arg3[%c17_91, %c0_92], %167 {strides = array<i32>} : memref<32x128xf32, #tpu.memory_space<vmem>>, vector<1x128xf32>,
    %cst_93 = arith.constant 1.800000e+01 : f32
    %169 = vector.broadcast %cst_93 : f32 to vector<8x128xf32>
    %170 = arith.cmpf oge, %6, %169 : vector<8x128xf32>
    %171 = arith.extui %170 : vector<8x128xi1> to vector<8x128xi32>
    %172 = arith.sitofp %171 : vector<8x128xi32> to vector<8x128xf32>
    %c18 = arith.constant 18 : index
    %c0_94 = arith.constant 0 : index
    %173 = vector.load %arg3[%c18, %c0_94] : memref<32x128xf32, #tpu.memory_space<vmem>>, vector<1x128xf32>
    %cst_95 = arith.constant dense<0.000000e+00> : vector<128xf32>
    %174 = vector.multi_reduction <add>, %172, %cst_95 [0] : vector<8x128xf32> to vector<128xf32>
    %175 = vector.shape_cast %174 : vector<128xf32> to vector<1x128xf32>
    %176 = arith.addf %173, %175 : vector<1x128xf32>
    %c18_96 = arith.constant 18 : index
    %c0_97 = arith.constant 0 : index
    %177 = vector.load %arg3[%c18_96, %c0_97] : memref<32x128xf32, #tpu.memory_space<vmem>>, vector<1x128xf32>
    tpu.vector_store %arg3[%c18_96, %c0_97], %176 {strides = array<i32>} : memref<32x128xf32, #tpu.memory_space<vmem>>, vector<1x128xf32>,
    %cst_98 = arith.constant 1.900000e+01 : f32
    %178 = vector.broadcast %cst_98 : f32 to vector<8x128xf32>
    %179 = arith.cmpf oge, %6, %178 : vector<8x128xf32>
    %180 = arith.extui %179 : vector<8x128xi1> to vector<8x128xi32>
    %181 = arith.sitofp %180 : vector<8x128xi32> to vector<8x128xf32>
    %c19 = arith.constant 19 : index
    %c0_99 = arith.constant 0 : index
    %182 = vector.load %arg3[%c19, %c0_99] : memref<32x128xf32, #tpu.memory_space<vmem>>, vector<1x128xf32>
    %cst_100 = arith.constant dense<0.000000e+00> : vector<128xf32>
    %183 = vector.multi_reduction <add>, %181, %cst_100 [0] : vector<8x128xf32> to vector<128xf32>
    %184 = vector.shape_cast %183 : vector<128xf32> to vector<1x128xf32>
    %185 = arith.addf %182, %184 : vector<1x128xf32>
    %c19_101 = arith.constant 19 : index
    %c0_102 = arith.constant 0 : index
    %186 = vector.load %arg3[%c19_101, %c0_102] : memref<32x128xf32, #tpu.memory_space<vmem>>, vector<1x128xf32>
    tpu.vector_store %arg3[%c19_101, %c0_102], %185 {strides = array<i32>} : memref<32x128xf32, #tpu.memory_space<vmem>>, vector<1x128xf32>,
    %cst_103 = arith.constant 2.000000e+01 : f32
    %187 = vector.broadcast %cst_103 : f32 to vector<8x128xf32>
    %188 = arith.cmpf oge, %6, %187 : vector<8x128xf32>
    %189 = arith.extui %188 : vector<8x128xi1> to vector<8x128xi32>
    %190 = arith.sitofp %189 : vector<8x128xi32> to vector<8x128xf32>
    %c20 = arith.constant 20 : index
    %c0_104 = arith.constant 0 : index
    %191 = vector.load %arg3[%c20, %c0_104] : memref<32x128xf32, #tpu.memory_space<vmem>>, vector<1x128xf32>
    %cst_105 = arith.constant dense<0.000000e+00> : vector<128xf32>
    %192 = vector.multi_reduction <add>, %190, %cst_105 [0] : vector<8x128xf32> to vector<128xf32>
    %193 = vector.shape_cast %192 : vector<128xf32> to vector<1x128xf32>
    %194 = arith.addf %191, %193 : vector<1x128xf32>
    %c20_106 = arith.constant 20 : index
    %c0_107 = arith.constant 0 : index
    %195 = vector.load %arg3[%c20_106, %c0_107] : memref<32x128xf32, #tpu.memory_space<vmem>>, vector<1x128xf32>
    tpu.vector_store %arg3[%c20_106, %c0_107], %194 {strides = array<i32>} : memref<32x128xf32, #tpu.memory_space<vmem>>, vector<1x128xf32>,
    %cst_108 = arith.constant 2.100000e+01 : f32
    %196 = vector.broadcast %cst_108 : f32 to vector<8x128xf32>
    %197 = arith.cmpf oge, %6, %196 : vector<8x128xf32>
    %198 = arith.extui %197 : vector<8x128xi1> to vector<8x128xi32>
    %199 = arith.sitofp %198 : vector<8x128xi32> to vector<8x128xf32>
    %c21 = arith.constant 21 : index
    %c0_109 = arith.constant 0 : index
    %200 = vector.load %arg3[%c21, %c0_109] : memref<32x128xf32, #tpu.memory_space<vmem>>, vector<1x128xf32>
    %cst_110 = arith.constant dense<0.000000e+00> : vector<128xf32>
    %201 = vector.multi_reduction <add>, %199, %cst_110 [0] : vector<8x128xf32> to vector<128xf32>
    %202 = vector.shape_cast %201 : vector<128xf32> to vector<1x128xf32>
    %203 = arith.addf %200, %202 : vector<1x128xf32>
    %c21_111 = arith.constant 21 : index
    %c0_112 = arith.constant 0 : index
    %204 = vector.load %arg3[%c21_111, %c0_112] : memref<32x128xf32, #tpu.memory_space<vmem>>, vector<1x128xf32>
    tpu.vector_store %arg3[%c21_111, %c0_112], %203 {strides = array<i32>} : memref<32x128xf32, #tpu.memory_space<vmem>>, vector<1x128xf32>,
    %cst_113 = arith.constant 2.200000e+01 : f32
    %205 = vector.broadcast %cst_113 : f32 to vector<8x128xf32>
    %206 = arith.cmpf oge, %6, %205 : vector<8x128xf32>
    %207 = arith.extui %206 : vector<8x128xi1> to vector<8x128xi32>
    %208 = arith.sitofp %207 : vector<8x128xi32> to vector<8x128xf32>
    %c22 = arith.constant 22 : index
    %c0_114 = arith.constant 0 : index
    %209 = vector.load %arg3[%c22, %c0_114] : memref<32x128xf32, #tpu.memory_space<vmem>>, vector<1x128xf32>
    %cst_115 = arith.constant dense<0.000000e+00> : vector<128xf32>
    %210 = vector.multi_reduction <add>, %208, %cst_115 [0] : vector<8x128xf32> to vector<128xf32>
    %211 = vector.shape_cast %210 : vector<128xf32> to vector<1x128xf32>
    %212 = arith.addf %209, %211 : vector<1x128xf32>
    %c22_116 = arith.constant 22 : index
    %c0_117 = arith.constant 0 : index
    %213 = vector.load %arg3[%c22_116, %c0_117] : memref<32x128xf32, #tpu.memory_space<vmem>>, vector<1x128xf32>
    tpu.vector_store %arg3[%c22_116, %c0_117], %212 {strides = array<i32>} : memref<32x128xf32, #tpu.memory_space<vmem>>, vector<1x128xf32>,
    %cst_118 = arith.constant 2.300000e+01 : f32
    %214 = vector.broadcast %cst_118 : f32 to vector<8x128xf32>
    %215 = arith.cmpf oge, %6, %214 : vector<8x128xf32>
    %216 = arith.extui %215 : vector<8x128xi1> to vector<8x128xi32>
    %217 = arith.sitofp %216 : vector<8x128xi32> to vector<8x128xf32>
    %c23 = arith.constant 23 : index
    %c0_119 = arith.constant 0 : index
    %218 = vector.load %arg3[%c23, %c0_119] : memref<32x128xf32, #tpu.memory_space<vmem>>, vector<1x128xf32>
    %cst_120 = arith.constant dense<0.000000e+00> : vector<128xf32>
    %219 = vector.multi_reduction <add>, %217, %cst_120 [0] : vector<8x128xf32> to vector<128xf32>
    %220 = vector.shape_cast %219 : vector<128xf32> to vector<1x128xf32>
    %221 = arith.addf %218, %220 : vector<1x128xf32>
    %c23_121 = arith.constant 23 : index
    %c0_122 = arith.constant 0 : index
    %222 = vector.load %arg3[%c23_121, %c0_122] : memref<32x128xf32, #tpu.memory_space<vmem>>, vector<1x128xf32>
    tpu.vector_store %arg3[%c23_121, %c0_122], %221 {strides = array<i32>} : memref<32x128xf32, #tpu.memory_space<vmem>>, vector<1x128xf32>,
    %cst_123 = arith.constant 2.400000e+01 : f32
    %223 = vector.broadcast %cst_123 : f32 to vector<8x128xf32>
    %224 = arith.cmpf oge, %6, %223 : vector<8x128xf32>
    %225 = arith.extui %224 : vector<8x128xi1> to vector<8x128xi32>
    %226 = arith.sitofp %225 : vector<8x128xi32> to vector<8x128xf32>
    %c24 = arith.constant 24 : index
    %c0_124 = arith.constant 0 : index
    %227 = vector.load %arg3[%c24, %c0_124] : memref<32x128xf32, #tpu.memory_space<vmem>>, vector<1x128xf32>
    %cst_125 = arith.constant dense<0.000000e+00> : vector<128xf32>
    %228 = vector.multi_reduction <add>, %226, %cst_125 [0] : vector<8x128xf32> to vector<128xf32>
    %229 = vector.shape_cast %228 : vector<128xf32> to vector<1x128xf32>
    %230 = arith.addf %227, %229 : vector<1x128xf32>
    %c24_126 = arith.constant 24 : index
    %c0_127 = arith.constant 0 : index
    %231 = vector.load %arg3[%c24_126, %c0_127] : memref<32x128xf32, #tpu.memory_space<vmem>>, vector<1x128xf32>
    tpu.vector_store %arg3[%c24_126, %c0_127], %230 {strides = array<i32>} : memref<32x128xf32, #tpu.memory_space<vmem>>, vector<1x128xf32>,
    %cst_128 = arith.constant 2.500000e+01 : f32
    %232 = vector.broadcast %cst_128 : f32 to vector<8x128xf32>
    %233 = arith.cmpf oge, %6, %232 : vector<8x128xf32>
    %234 = arith.extui %233 : vector<8x128xi1> to vector<8x128xi32>
    %235 = arith.sitofp %234 : vector<8x128xi32> to vector<8x128xf32>
    %c25 = arith.constant 25 : index
    %c0_129 = arith.constant 0 : index
    %236 = vector.load %arg3[%c25, %c0_129] : memref<32x128xf32, #tpu.memory_space<vmem>>, vector<1x128xf32>
    %cst_130 = arith.constant dense<0.000000e+00> : vector<128xf32>
    %237 = vector.multi_reduction <add>, %235, %cst_130 [0] : vector<8x128xf32> to vector<128xf32>
    %238 = vector.shape_cast %237 : vector<128xf32> to vector<1x128xf32>
    %239 = arith.addf %236, %238 : vector<1x128xf32>
    %c25_131 = arith.constant 25 : index
    %c0_132 = arith.constant 0 : index
    %240 = vector.load %arg3[%c25_131, %c0_132] : memref<32x128xf32, #tpu.memory_space<vmem>>, vector<1x128xf32>
    tpu.vector_store %arg3[%c25_131, %c0_132], %239 {strides = array<i32>} : memref<32x128xf32, #tpu.memory_space<vmem>>, vector<1x128xf32>,
    %cst_133 = arith.constant 2.600000e+01 : f32
    %241 = vector.broadcast %cst_133 : f32 to vector<8x128xf32>
    %242 = arith.cmpf oge, %6, %241 : vector<8x128xf32>
    %243 = arith.extui %242 : vector<8x128xi1> to vector<8x128xi32>
    %244 = arith.sitofp %243 : vector<8x128xi32> to vector<8x128xf32>
    %c26 = arith.constant 26 : index
    %c0_134 = arith.constant 0 : index
    %245 = vector.load %arg3[%c26, %c0_134] : memref<32x128xf32, #tpu.memory_space<vmem>>, vector<1x128xf32>
    %cst_135 = arith.constant dense<0.000000e+00> : vector<128xf32>
    %246 = vector.multi_reduction <add>, %244, %cst_135 [0] : vector<8x128xf32> to vector<128xf32>
    %247 = vector.shape_cast %246 : vector<128xf32> to vector<1x128xf32>
    %248 = arith.addf %245, %247 : vector<1x128xf32>
    %c26_136 = arith.constant 26 : index
    %c0_137 = arith.constant 0 : index
    %249 = vector.load %arg3[%c26_136, %c0_137] : memref<32x128xf32, #tpu.memory_space<vmem>>, vector<1x128xf32>
    tpu.vector_store %arg3[%c26_136, %c0_137], %248 {strides = array<i32>} : memref<32x128xf32, #tpu.memory_space<vmem>>, vector<1x128xf32>,
    %cst_138 = arith.constant 2.700000e+01 : f32
    %250 = vector.broadcast %cst_138 : f32 to vector<8x128xf32>
    %251 = arith.cmpf oge, %6, %250 : vector<8x128xf32>
    %252 = arith.extui %251 : vector<8x128xi1> to vector<8x128xi32>
    %253 = arith.sitofp %252 : vector<8x128xi32> to vector<8x128xf32>
    %c27 = arith.constant 27 : index
    %c0_139 = arith.constant 0 : index
    %254 = vector.load %arg3[%c27, %c0_139] : memref<32x128xf32, #tpu.memory_space<vmem>>, vector<1x128xf32>
    %cst_140 = arith.constant dense<0.000000e+00> : vector<128xf32>
    %255 = vector.multi_reduction <add>, %253, %cst_140 [0] : vector<8x128xf32> to vector<128xf32>
    %256 = vector.shape_cast %255 : vector<128xf32> to vector<1x128xf32>
    %257 = arith.addf %254, %256 : vector<1x128xf32>
    %c27_141 = arith.constant 27 : index
    %c0_142 = arith.constant 0 : index
    %258 = vector.load %arg3[%c27_141, %c0_142] : memref<32x128xf32, #tpu.memory_space<vmem>>, vector<1x128xf32>
    tpu.vector_store %arg3[%c27_141, %c0_142], %257 {strides = array<i32>} : memref<32x128xf32, #tpu.memory_space<vmem>>, vector<1x128xf32>,
    %cst_143 = arith.constant 2.800000e+01 : f32
    %259 = vector.broadcast %cst_143 : f32 to vector<8x128xf32>
    %260 = arith.cmpf oge, %6, %259 : vector<8x128xf32>
    %261 = arith.extui %260 : vector<8x128xi1> to vector<8x128xi32>
    %262 = arith.sitofp %261 : vector<8x128xi32> to vector<8x128xf32>
    %c28 = arith.constant 28 : index
    %c0_144 = arith.constant 0 : index
    %263 = vector.load %arg3[%c28, %c0_144] : memref<32x128xf32, #tpu.memory_space<vmem>>, vector<1x128xf32>
    %cst_145 = arith.constant dense<0.000000e+00> : vector<128xf32>
    %264 = vector.multi_reduction <add>, %262, %cst_145 [0] : vector<8x128xf32> to vector<128xf32>
    %265 = vector.shape_cast %264 : vector<128xf32> to vector<1x128xf32>
    %266 = arith.addf %263, %265 : vector<1x128xf32>
    %c28_146 = arith.constant 28 : index
    %c0_147 = arith.constant 0 : index
    %267 = vector.load %arg3[%c28_146, %c0_147] : memref<32x128xf32, #tpu.memory_space<vmem>>, vector<1x128xf32>
    tpu.vector_store %arg3[%c28_146, %c0_147], %266 {strides = array<i32>} : memref<32x128xf32, #tpu.memory_space<vmem>>, vector<1x128xf32>,
    %cst_148 = arith.constant 2.900000e+01 : f32
    %268 = vector.broadcast %cst_148 : f32 to vector<8x128xf32>
    %269 = arith.cmpf oge, %6, %268 : vector<8x128xf32>
    %270 = arith.extui %269 : vector<8x128xi1> to vector<8x128xi32>
    %271 = arith.sitofp %270 : vector<8x128xi32> to vector<8x128xf32>
    %c29 = arith.constant 29 : index
    %c0_149 = arith.constant 0 : index
    %272 = vector.load %arg3[%c29, %c0_149] : memref<32x128xf32, #tpu.memory_space<vmem>>, vector<1x128xf32>
    %cst_150 = arith.constant dense<0.000000e+00> : vector<128xf32>
    %273 = vector.multi_reduction <add>, %271, %cst_150 [0] : vector<8x128xf32> to vector<128xf32>
    %274 = vector.shape_cast %273 : vector<128xf32> to vector<1x128xf32>
    %275 = arith.addf %272, %274 : vector<1x128xf32>
    %c29_151 = arith.constant 29 : index
    %c0_152 = arith.constant 0 : index
    %276 = vector.load %arg3[%c29_151, %c0_152] : memref<32x128xf32, #tpu.memory_space<vmem>>, vector<1x128xf32>
    tpu.vector_store %arg3[%c29_151, %c0_152], %275 {strides = array<i32>} : memref<32x128xf32, #tpu.memory_space<vmem>>, vector<1x128xf32>,
    %cst_153 = arith.constant 3.000000e+01 : f32
    %277 = vector.broadcast %cst_153 : f32 to vector<8x128xf32>
    %278 = arith.cmpf oge, %6, %277 : vector<8x128xf32>
    %279 = arith.extui %278 : vector<8x128xi1> to vector<8x128xi32>
    %280 = arith.sitofp %279 : vector<8x128xi32> to vector<8x128xf32>
    %c30 = arith.constant 30 : index
    %c0_154 = arith.constant 0 : index
    %281 = vector.load %arg3[%c30, %c0_154] : memref<32x128xf32, #tpu.memory_space<vmem>>, vector<1x128xf32>
    %cst_155 = arith.constant dense<0.000000e+00> : vector<128xf32>
    %282 = vector.multi_reduction <add>, %280, %cst_155 [0] : vector<8x128xf32> to vector<128xf32>
    %283 = vector.shape_cast %282 : vector<128xf32> to vector<1x128xf32>
    %284 = arith.addf %281, %283 : vector<1x128xf32>
    %c30_156 = arith.constant 30 : index
    %c0_157 = arith.constant 0 : index
    %285 = vector.load %arg3[%c30_156, %c0_157] : memref<32x128xf32, #tpu.memory_space<vmem>>, vector<1x128xf32>
    tpu.vector_store %arg3[%c30_156, %c0_157], %284 {strides = array<i32>} : memref<32x128xf32, #tpu.memory_space<vmem>>, vector<1x128xf32>,
    %cst_158 = arith.constant -1.000000e+00 : f32
    %286 = vector.broadcast %cst_158 : f32 to vector<8x128xf32>
    %287 = arith.cmpf one, %3, %286 : vector<8x128xf32>
    %288 = arith.extui %287 : vector<8x128xi1> to vector<8x128xi32>
    %289 = arith.sitofp %288 : vector<8x128xi32> to vector<8x128xf32>
    %c31 = arith.constant 31 : index
    %c0_159 = arith.constant 0 : index
    %290 = vector.load %arg3[%c31, %c0_159] : memref<32x128xf32, #tpu.memory_space<vmem>>, vector<1x128xf32>
    %cst_160 = arith.constant dense<0.000000e+00> : vector<128xf32>
    %291 = vector.multi_reduction <add>, %289, %cst_160 [0] : vector<8x128xf32> to vector<128xf32>
    %292 = vector.shape_cast %291 : vector<128xf32> to vector<1x128xf32>
    %293 = arith.addf %290, %292 : vector<1x128xf32>
    %c31_161 = arith.constant 31 : index
    %c0_162 = arith.constant 0 : index
    %294 = vector.load %arg3[%c31_161, %c0_162] : memref<32x128xf32, #tpu.memory_space<vmem>>, vector<1x128xf32>
    tpu.vector_store %arg3[%c31_161, %c0_162], %293 {strides = array<i32>} : memref<32x128xf32, #tpu.memory_space<vmem>>, vector<1x128xf32>,
    return
  }
  func.func @transform_0(%arg0: i32, %arg1: i32) -> (i32, i32) {
    %c1_i32 = arith.constant 1 : i32
    %0 = arith.muli %arg0, %c1_i32 : i32
    %1 = arith.addi %0, %arg1 : i32
    %c0_i32 = arith.constant 0 : i32
    %c0_i32_0 = arith.constant 0 : i32
    return %1, %c0_i32 : i32, i32
  }
  func.func @transform_1(%arg0: i32, %arg1: i32) -> (i32, i32) {
    %c0_i32 = arith.constant 0 : i32
    %c0_i32_0 = arith.constant 0 : i32
    return %arg0, %c0_i32 : i32, i32
  }
}

</mosaic_0001>

<bundles_post_ra>
// kernel: tpu_custom_call.1
= control target key start
LH: loop header
LB: loop body
LE: loop exit
PB: predicated region body
PF: predicated region fallthrough
CT: control target
= control target key end

     0   :  { %6 = vsyncpa [#allocation3], 0  ;;  %s1176_s0 = inlined_call_operand.hbm [shape: f32[16,128], index: 0, kind: input, shape index: {}]   ;;  %s1177_s1 = inlined_call_operand.hbm [shape: f32[64,128], index: 1, kind: output, shape index: {}]  }
   0x1   :  { %8 = vsyncpa [#allocation3 + $0x1], 0 }
   0x2   :  { %9 = vsyncpa [#allocation4], 0 }
   0x3   :  { %11 = vsyncpa [#allocation4 + $0x1], 0  ;;  %s881_s6 = smov 0   ;;  %s883_s7 = smov 0  }
   0x4   :  { %s885_s8 = smov 0   ;;  %s887_s9 = smov 0  }
   0x5   :  { %s889_s10 = smov 0   ;;  %s891_s11 = smov 0  }
   0x6 LB: > { %s641_s12 = sadd.s32 4294967295, %s864_s11   ;;  %s642_s13 = sadd.s32 4294967294, %s864_s11   ;;  %s864_s11 = sphi %s891_s11, %s17_s11   ;;  %s860_s10 = sphi %s889_s10, %s1189_s10   ;;  %s856_s9 = sphi %s887_s9, %s1188_s9   ;;  %s852_s8 = sphi %s885_s8, %s1187_s8   ;;  %s848_s7 = sphi %s883_s7, %s1186_s7   ;;  %s844_s6 = sphi %s881_s6, %s1185_s6  }
   0x7   : > { %s29_s14 = sadd.s32 1, %s860_s10  ;;  %s38_s15 = sadd.s32 1, %s852_s8 }
   0x8   : > { %p31_p0 = scmp.ge.s32.totalorder %s29_s14, 2  ;;  %p45_p1 = scmp.ne.s32.totalorder %s852_s8, %s848_s7 }
   0x9   : > { %p46_p2 = scmp.eq.s32.totalorder %s864_s11, 0  ;;  %p51_p3 = scmp.ne.s32.totalorder %s848_s7, %s844_s6 }
   0xa   : > { %s1191_s14 = smov (%p31_p0, %s29_s14), 0  ;;  %p52_p5 = scmp.eq.s32.totalorder %s641_s12, 0 }
   0xb   : > { %p922_p4 = por %p46_p2, %p45_p1  ;;  %s35_s17 = ssub.s32 %s860_s10, %s1191_s14 }
   0xc   : > { %p75_p6 = scmp.eq.s32.totalorder %s641_s12, 1  ;;  %p36_p7 = scmp.eq.s32.totalorder %s35_s17, 0 }
   0xd   : > { %p928_p8 = por %p52_p5, %p51_p3  ;;  %p81_p10 = scmp.eq.s32.totalorder %s642_s13, 1 }
   0xe   : > { %p932_p9 = por %p75_p6, %p45_p1  ;;  %p701_p13 = scmp.lt.s32.totalorder %s864_s11, 2 }
   0xf   : > { %s937_s20 = scalar_select %p36_p7, %s852_s8, %s38_s15  }
  0x10   : > { %p939_p11 = por %p81_p10, %p51_p3  ;;  %s101_s22 = sand.u32 1, %s852_s8  }
  0x11   : > { %s645_s23 = sshll.u32 %s101_s22, 3  ;;  %s646_s24 = sshll.u32 %s860_s10, 7 }
  0x12   : > { %s1181_s21 = scalar_select %p939_p11, 1, 0 }
  0x13   : > { %s111_s27 = scalar_lea.hbm %s1176_s0, %s646_s24  ;;  %s105_s28 = scalar_lea.vmem [#allocation2], %s645_s23 }
  0x14   : > { %s113_s29 = sshll.u32 %s105_s28, 4  ;;  %p952_p0 = pnand %p701_p13, %p922_p4  ;;  %s114_s29 = int_to_ptr.vmem [resolvable:$true] %s113_s29 }
  0x15   : > { %p647_p1 = scmp.ge.s32.totalorder %s864_s11, 1  ;;  %p118_p2 = scmp.lt.s32.totalorder %s864_s11, 3 }
  0x16   : > { %s102_s2 = scalar_lea.sflag [#allocation3], %s101_s22  ;;  %p758_p3 = pneg %p952_p0 }
  0x17   : > { %s769_s3 = scalar_lea.vmem %s114_s29, 128  ;;  %s866_s4 = smov [#allocation2]  }
  0x18   : > { %p770_p5 = scmp.ne.s32.totalorder %s114_s29, %s769_s3  ;;  %s774_s5 = sshll.u32 %s866_s4, 4  ;;  %s775_s5 = int_to_ptr.vmem [resolvable:$false] %s774_s5 }
  0x19   : > { %s776_s12 = scalar_lea.vmem %s775_s5, 256  ;;  %p777_p10 = scmp.lt.s32.totalorder %s114_s29, %s775_s5 }
  0x1a   : > { %p772_p6 = pnand %p770_p5, %p758_p3  ;;  %p778_p12 = scmp.lt.s32.totalorder %s776_s12, %s769_s3 }
  0x1c   : > { %p773_p7 = pneg %p772_p6  ;;  %p779_p4 = por %p778_p12, %p777_p10 }
  0x1e   : > { %p780_p13 = pnand %p779_p4, %p773_p7 }
  0x20   : > { %783 = shalt.err (!%p780_p13)
}
  0x21   : > { %696 = dma.hbm_to_vmem [thread:$0]  (!%p952_p0), %s111_s27, 128, %s114_s29, %s102_s2  }
  0x22   : > { %p119_p11 = pnand %p647_p1, %p118_p2 }
  0x23   : > { %s967_s13 = sand.u32 (!%p119_p11), 1, %s848_s7  }
  0x24   : > { %122 = sbr.rel (%p119_p11) target bundleno = 153 (0x99), region = 24  ;;  %s648_s15 = sshll.u32 (!%p119_p11), %s967_s13, 3 }
  0x25   : > { %s125_s16 = scalar_lea.sflag (!%p119_p11), [#allocation3], %s967_s13  ;;  %s128_s17 = scalar_lea.vmem (!%p119_p11), [#allocation2], %s648_s15 }
  0x29   : > { %835 = dma.done.wait (%p928_p8), %s125_s16, 128  }
  0x2a   : > { %837 = vsyncadd (%p928_p8), %s125_s16, 4294967168  ;;  %s649_s22 = sshll.u32 %s967_s13, 5  ;;  %v867_v0 = vmov 0.0   ;;  %v157_v1 = vld [vmem:[%s128_s17] sm:$0xff]  ;;  %s688_s18 = sshll.u32 %s856_s9, 9 }
  0x2b   : > { %s976_s23 = scalar_lea.vmem [#allocation5], %s649_s22  ;;  %v158_v2 = vmul.f32 1.442695, %v157_v1  ;;  %vm533_vm0 = vcmp.ne.f32.partialorder %v157_v1, -1.0  ;;  %s1123_s9 = scalar_lea.hbm %s1177_s1, %s688_s18 }
  0x2c   : > { %153 = vst [vmem:[%s976_s23] sm:$0xff] %v867_v0  ;;  %154 = vst [vmem:[%s976_s23 + $0x8] sm:$0xff] %v867_v0  ;;  %v682_v3 = vsel %vm533_vm0, 1.0, %v867_v0  ;;  %s559_s24 = sshll.u32 %s976_s23, 4  ;;  %s546_s27 = scalar_lea.sflag [#allocation4], %s967_s13  ;;  %s1125_s24 = int_to_ptr.vmem [resolvable:$true] %s559_s24 }
  0x2d   : > { %155 = vst [vmem:[%s976_s23 + $0x10] sm:$0xff] %v867_v0  ;;  %156 = vst [vmem:[%s976_s23 + $0x18] sm:$0xff] %v867_v0  ;;  %754 = vpow2.f32 %v158_v2  ;;  %v537_v4 = vrot.slane %v682_v3, 4  ;;  %s784_s28 = scalar_lea.vmem %s1125_s24, 512  ;;  %s868_s29 = smov [#allocation5]  }
  0x2e   : > { %p785_p8 = scmp.ne.s32.totalorder %s1125_s24, %s784_s28  ;;  %s788_s30 = sshll.u32 %s868_s29, 4  ;;  %s789_s30 = int_to_ptr.vmem [resolvable:$false] %s788_s30 }
  0x2f   : > { %v987_v5 = vadd.f32 %v682_v3, %v537_v4  ;;  %s790_s2 = scalar_lea.vmem %s789_s30, 1024  ;;  %p791_p0 = scmp.lt.s32.totalorder %s1125_s24, %s789_s30 }
  0x30   : > { %p786_p11 = pnand %p785_p8, %p932_p9  ;;  %p792_p1 = scmp.lt.s32.totalorder %s790_s2, %s784_s28 }
  0x31   : > { %v539_v8 = vrot.slane %v987_v5, 2 }
  0x32   : > { %p787_p12 = pneg %p786_p11  ;;  %p793_p2 = por %p792_p1, %p791_p0 }
  0x33   : > { %v164_v37 = vld [vmem:[%s976_s23] sm:$0x1]  ;;  %v176_v38 = vld [vmem:[%s976_s23 + $0x1] sm:$0x1]  ;;  %v188_v45 = vld [vmem:[%s976_s23 + $0x2] sm:$0x1] }
  0x34   : > { %v200_v48 = vld [vmem:[%s976_s23 + $0x3] sm:$0x1]  ;;  %v212_v2 = vld [vmem:[%s976_s23 + $0x4] sm:$0x1]  ;;  %v224_v3 = vld [vmem:[%s976_s23 + $0x5] sm:$0x1]  ;;  %p794_p3 = pnand %p793_p2, %p787_p12 }
  0x3a   : > { %v755_v6 = vpop.eup %754 }
  0x3b   : > { %v989_v7 = vadd.f32 -1.0, %v755_v6 }
  0x3d   : > { %vm161_vm1 = vcmp.ge.f32.partialorder %v989_v7, 0.0  ;;  %vm173_vm2 = vcmp.ge.f32.partialorder %v989_v7, 1.0  ;;  %vm185_vm3 = vcmp.ge.f32.partialorder %v989_v7, 2.0  ;;  %vm197_vm4 = vcmp.ge.f32.partialorder %v989_v7, 3.0 }
  0x3e   : > { %v651_v9 = vsel %vm161_vm1, 1.0, %v867_v0  ;;  %v652_v10 = vsel %vm173_vm2, 1.0, %v867_v0  ;;  %v653_v11 = vsel %vm185_vm3, 1.0, %v867_v0  ;;  %v654_v12 = vsel %vm197_vm4, 1.0, %v867_v0 }
  0x3f   : > { %v165_v13 = vrot.slane %v651_v9, 4  ;;  %v177_v14 = vrot.slane %v652_v10, 4  ;;  %v189_v15 = vrot.slane %v653_v11, 4  ;;  %v201_v16 = vrot.slane %v654_v12, 4 }
  0x40   : > { %vm209_vm5 = vcmp.ge.f32.partialorder %v989_v7, 4.0  ;;  %vm221_vm6 = vcmp.ge.f32.partialorder %v989_v7, 5.0  ;;  %vm233_vm7 = vcmp.ge.f32.partialorder %v989_v7, 6.0  ;;  %vm245_vm8 = vcmp.ge.f32.partialorder %v989_v7, 7.0 }
  0x41   : > { %v166_v17 = vadd.f32 %v651_v9, %v165_v13  ;;  %v178_v18 = vadd.f32 %v652_v10, %v177_v14  ;;  %v190_v19 = vadd.f32 %v653_v11, %v189_v15  ;;  %v202_v20 = vadd.f32 %v654_v12, %v201_v16  ;;  %v236_v9 = vld [vmem:[%s976_s23 + $0x6] sm:$0x1]  ;;  %v248_v12 = vld [vmem:[%s976_s23 + $0x7] sm:$0x1] }
  0x42   : > { %v655_v21 = vsel %vm209_vm5, 1.0, %v867_v0  ;;  %v656_v22 = vsel %vm221_vm6, 1.0, %v867_v0  ;;  %v657_v23 = vsel %vm233_vm7, 1.0, %v867_v0  ;;  %v658_v24 = vsel %vm245_vm8, 1.0, %v867_v0 }
  0x43   : > { %v167_v25 = vrot.slane %v166_v17, 2  ;;  %v179_v26 = vrot.slane %v178_v18, 2  ;;  %v191_v27 = vrot.slane %v190_v19, 2  ;;  %v203_v28 = vrot.slane %v202_v20, 2 }
  0x44   : > { %v213_v29 = vrot.slane %v655_v21, 4  ;;  %v225_v30 = vrot.slane %v656_v22, 4  ;;  %v237_v31 = vrot.slane %v657_v23, 4  ;;  %v249_v32 = vrot.slane %v658_v24, 4 }
  0x45   : > { %v168_v33 = vadd.f32 %v167_v25, %v166_v17  ;;  %v180_v34 = vadd.f32 %v179_v26, %v178_v18  ;;  %v192_v35 = vadd.f32 %v191_v27, %v190_v19  ;;  %v204_v36 = vadd.f32 %v203_v28, %v202_v20 }
  0x46   : > { %v214_v39 = vadd.f32 %v655_v21, %v213_v29  ;;  %v226_v40 = vadd.f32 %v656_v22, %v225_v30  ;;  %v238_v41 = vadd.f32 %v657_v23, %v237_v31  ;;  %v250_v42 = vadd.f32 %v658_v24, %v249_v32 }
  0x47   : > { %v169_v43 = vrot.slane %v168_v33, 1  ;;  %v181_v44 = vrot.slane %v180_v34, 1  ;;  %v193_v46 = vrot.slane %v192_v35, 1  ;;  %v205_v47 = vrot.slane %v204_v36, 1 }
  0x48   : > { %v215_v49 = vrot.slane %v214_v39, 2  ;;  %v227_v50 = vrot.slane %v226_v40, 2  ;;  %v239_v51 = vrot.slane %v238_v41, 2  ;;  %v251_v52 = vrot.slane %v250_v42, 2 }
  0x49   : > { %v170_v53 = vadd.f32 %v169_v43, %v168_v33  ;;  %v182_v54 = vadd.f32 %v181_v44, %v180_v34  ;;  %v194_v55 = vadd.f32 %v193_v46, %v192_v35  ;;  %v206_v56 = vadd.f32 %v205_v47, %v204_v36 }
  0x4a   : > { %v216_v57 = vadd.f32 %v215_v49, %v214_v39  ;;  %v228_v58 = vadd.f32 %v227_v50, %v226_v40  ;;  %v240_v59 = vadd.f32 %v239_v51, %v238_v41  ;;  %v252_v60 = vadd.f32 %v251_v52, %v250_v42  ;;  %v260_v49 = vld [vmem:[%s976_s23 + $0x8] sm:$0x1]  ;;  %v272_v50 = vld [vmem:[%s976_s23 + $0x9] sm:$0x1] }
  0x4b   : > { %v171_v61 = vadd.f32 %v170_v53, %v164_v37  ;;  %v183_v62 = vadd.f32 %v182_v54, %v176_v38  ;;  %v195_v63 = vadd.f32 %v194_v55, %v188_v45  ;;  %v207_v1 = vadd.f32 %v206_v56, %v200_v48 }
  0x4c   : > { %v217_v4 = vrot.slane %v216_v57, 1  ;;  %v229_v6 = vrot.slane %v228_v58, 1  ;;  %v241_v10 = vrot.slane %v240_v59, 1  ;;  %v253_v11 = vrot.slane %v252_v60, 1 }
  0x4d   : > { %172 = vst [vmem:[%s976_s23] sm:$0x1] %v171_v61  ;;  %184 = vst [vmem:[%s976_s23 + $0x1] sm:$0x1] %v183_v62  ;;  %vm257_vm9 = vcmp.ge.f32.partialorder %v989_v7, 8.0  ;;  %vm269_vm10 = vcmp.ge.f32.partialorder %v989_v7, 9.0  ;;  %vm281_vm11 = vcmp.ge.f32.partialorder %v989_v7, 10.0 }
  0x4e   : > { %196 = vst [vmem:[%s976_s23 + $0x2] sm:$0x1] %v195_v63  ;;  %208 = vst [vmem:[%s976_s23 + $0x3] sm:$0x1] %v207_v1  ;;  %vm293_vm12 = vcmp.ge.f32.partialorder %v989_v7, 11.0  ;;  %v218_v13 = vadd.f32 %v217_v4, %v216_v57  ;;  %v230_v14 = vadd.f32 %v229_v6, %v228_v58  ;;  %v242_v15 = vadd.f32 %v241_v10, %v240_v59 }
  0x4f   : > { %v254_v16 = vadd.f32 %v253_v11, %v252_v60  ;;  %v659_v17 = vsel %vm257_vm9, 1.0, %v867_v0  ;;  %v660_v18 = vsel %vm269_vm10, 1.0, %v867_v0  ;;  %v661_v19 = vsel %vm281_vm11, 1.0, %v867_v0  ;;  %v284_v57 = vld [vmem:[%s976_s23 + $0xa] sm:$0x1] }
  0x50   : > { %v662_v20 = vsel %vm293_vm12, 1.0, %v867_v0  ;;  %v219_v21 = vadd.f32 %v218_v13, %v212_v2  ;;  %v231_v22 = vadd.f32 %v230_v14, %v224_v3  ;;  %v243_v23 = vadd.f32 %v242_v15, %v236_v9  ;;  %v296_v60 = vld [vmem:[%s976_s23 + $0xb] sm:$0x1] }
  0x51   : > { %v255_v24 = vadd.f32 %v254_v16, %v248_v12  ;;  %v261_v25 = vrot.slane %v659_v17, 4  ;;  %v273_v26 = vrot.slane %v660_v18, 4  ;;  %v285_v27 = vrot.slane %v661_v19, 4 }
  0x52   : > { %v297_v28 = vrot.slane %v662_v20, 4  ;;  %220 = vst [vmem:[%s976_s23 + $0x4] sm:$0x1] %v219_v21  ;;  %232 = vst [vmem:[%s976_s23 + $0x5] sm:$0x1] %v231_v22  ;;  %vm305_vm13 = vcmp.ge.f32.partialorder %v989_v7, 12.0 }
  0x53   : > { %244 = vst [vmem:[%s976_s23 + $0x6] sm:$0x1] %v243_v23  ;;  %256 = vst [vmem:[%s976_s23 + $0x7] sm:$0x1] %v255_v24  ;;  %vm317_vm14 = vcmp.ge.f32.partialorder %v989_v7, 13.0  ;;  %vm329_vm15 = vcmp.ge.f32.partialorder %v989_v7, 14.0  ;;  %v262_v29 = vadd.f32 %v659_v17, %v261_v25  ;;  %v274_v30 = vadd.f32 %v660_v18, %v273_v26 }
  0x54   : > { %vm341_vm0 = vcmp.ge.f32.partialorder %v989_v7, 15.0  ;;  %v286_v31 = vadd.f32 %v661_v19, %v285_v27  ;;  %v298_v32 = vadd.f32 %v662_v20, %v297_v28  ;;  %v663_v33 = vsel %vm305_vm13, 1.0, %v867_v0  ;;  %v308_v17 = vld [vmem:[%s976_s23 + $0xc] sm:$0x1]  ;;  %v320_v18 = vld [vmem:[%s976_s23 + $0xd] sm:$0x1] }
  0x55   : > { %v664_v34 = vsel %vm317_vm14, 1.0, %v867_v0  ;;  %v665_v35 = vsel %vm329_vm15, 1.0, %v867_v0  ;;  %v666_v36 = vsel %vm341_vm0, 1.0, %v867_v0  ;;  %v263_v37 = vrot.slane %v262_v29, 2  ;;  %v332_v21 = vld [vmem:[%s976_s23 + $0xe] sm:$0x1] }
  0x56   : > { %v275_v38 = vrot.slane %v274_v30, 2  ;;  %v287_v39 = vrot.slane %v286_v31, 2  ;;  %v299_v40 = vrot.slane %v298_v32, 2  ;;  %v309_v41 = vrot.slane %v663_v33, 4  ;;  %v344_v24 = vld [vmem:[%s976_s23 + $0xf] sm:$0x1] }
  0x57   : > { %v321_v42 = vrot.slane %v664_v34, 4  ;;  %v333_v43 = vrot.slane %v665_v35, 4  ;;  %v345_v44 = vrot.slane %v666_v36, 4  ;;  %v264_v45 = vadd.f32 %v263_v37, %v262_v29 }
  0x58   : > { %v276_v46 = vadd.f32 %v275_v38, %v274_v30  ;;  %v288_v47 = vadd.f32 %v287_v39, %v286_v31  ;;  %v300_v48 = vadd.f32 %v299_v40, %v298_v32  ;;  %v310_v51 = vadd.f32 %v663_v33, %v309_v41 }
  0x59   : > { %v322_v52 = vadd.f32 %v664_v34, %v321_v42  ;;  %v334_v53 = vadd.f32 %v665_v35, %v333_v43  ;;  %v346_v54 = vadd.f32 %v666_v36, %v345_v44  ;;  %v265_v55 = vrot.slane %v264_v45, 1 }
  0x5a   : > { %v277_v56 = vrot.slane %v276_v46, 1  ;;  %v289_v58 = vrot.slane %v288_v47, 1  ;;  %v301_v59 = vrot.slane %v300_v48, 1  ;;  %v311_v61 = vrot.slane %v310_v51, 2 }
  0x5b   : > { %v323_v62 = vrot.slane %v322_v52, 2  ;;  %v335_v63 = vrot.slane %v334_v53, 2  ;;  %v347_v1 = vrot.slane %v346_v54, 2  ;;  %v266_v2 = vadd.f32 %v265_v55, %v264_v45 }
  0x5c   : > { %v278_v3 = vadd.f32 %v277_v56, %v276_v46  ;;  %v290_v4 = vadd.f32 %v289_v58, %v288_v47  ;;  %v302_v6 = vadd.f32 %v301_v59, %v300_v48  ;;  %v312_v9 = vadd.f32 %v311_v61, %v310_v51  ;;  %v356_v61 = vld [vmem:[%s976_s23 + $0x10] sm:$0x1] }
  0x5d   : > { %v324_v10 = vadd.f32 %v323_v62, %v322_v52  ;;  %v336_v11 = vadd.f32 %v335_v63, %v334_v53  ;;  %v348_v12 = vadd.f32 %v347_v1, %v346_v54  ;;  %v267_v13 = vadd.f32 %v266_v2, %v260_v49  ;;  %v368_v62 = vld [vmem:[%s976_s23 + $0x11] sm:$0x1] }
  0x5e   : > { %v279_v14 = vadd.f32 %v278_v3, %v272_v50  ;;  %v291_v15 = vadd.f32 %v290_v4, %v284_v57  ;;  %v303_v16 = vadd.f32 %v302_v6, %v296_v60  ;;  %v313_v19 = vrot.slane %v312_v9, 1 }
  0x5f   : > { %v325_v20 = vrot.slane %v324_v10, 1  ;;  %v337_v22 = vrot.slane %v336_v11, 1  ;;  %v349_v23 = vrot.slane %v348_v12, 1  ;;  %268 = vst [vmem:[%s976_s23 + $0x8] sm:$0x1] %v267_v13  ;;  %vm353_vm1 = vcmp.ge.f32.partialorder %v989_v7, 16.0 }
  0x60   : > { %280 = vst [vmem:[%s976_s23 + $0x9] sm:$0x1] %v279_v14  ;;  %292 = vst [vmem:[%s976_s23 + $0xa] sm:$0x1] %v291_v15  ;;  %vm365_vm2 = vcmp.ge.f32.partialorder %v989_v7, 17.0  ;;  %vm377_vm3 = vcmp.ge.f32.partialorder %v989_v7, 18.0  ;;  %v314_v25 = vadd.f32 %v313_v19, %v312_v9 }
  0x61   : > { %304 = vst [vmem:[%s976_s23 + $0xb] sm:$0x1] %v303_v16  ;;  %vm389_vm4 = vcmp.ge.f32.partialorder %v989_v7, 19.0  ;;  %v326_v26 = vadd.f32 %v325_v20, %v324_v10  ;;  %v338_v27 = vadd.f32 %v337_v22, %v336_v11  ;;  %v350_v28 = vadd.f32 %v349_v23, %v348_v12  ;;  %v380_v9 = vld [vmem:[%s976_s23 + $0x12] sm:$0x1] }
  0x62   : > { %v667_v29 = vsel %vm353_vm1, 1.0, %v867_v0  ;;  %v668_v30 = vsel %vm365_vm2, 1.0, %v867_v0  ;;  %v669_v31 = vsel %vm377_vm3, 1.0, %v867_v0  ;;  %v670_v32 = vsel %vm389_vm4, 1.0, %v867_v0  ;;  %v392_v12 = vld [vmem:[%s976_s23 + $0x13] sm:$0x1] }
  0x63   : > { %v315_v33 = vadd.f32 %v314_v25, %v308_v17  ;;  %v327_v34 = vadd.f32 %v326_v26, %v320_v18  ;;  %v339_v35 = vadd.f32 %v338_v27, %v332_v21  ;;  %v351_v36 = vadd.f32 %v350_v28, %v344_v24 }
  0x64   : > { %v357_v37 = vrot.slane %v667_v29, 4  ;;  %v369_v38 = vrot.slane %v668_v30, 4  ;;  %v381_v39 = vrot.slane %v669_v31, 4  ;;  %v393_v40 = vrot.slane %v670_v32, 4 }
  0x65   : > { %316 = vst [vmem:[%s976_s23 + $0xc] sm:$0x1] %v315_v33  ;;  %328 = vst [vmem:[%s976_s23 + $0xd] sm:$0x1] %v327_v34  ;;  %vm401_vm5 = vcmp.ge.f32.partialorder %v989_v7, 20.0  ;;  %vm413_vm6 = vcmp.ge.f32.partialorder %v989_v7, 21.0 }
  0x66   : > { %340 = vst [vmem:[%s976_s23 + $0xe] sm:$0x1] %v339_v35  ;;  %352 = vst [vmem:[%s976_s23 + $0xf] sm:$0x1] %v351_v36  ;;  %vm425_vm7 = vcmp.ge.f32.partialorder %v989_v7, 22.0  ;;  %vm437_vm8 = vcmp.ge.f32.partialorder %v989_v7, 23.0  ;;  %v358_v41 = vadd.f32 %v667_v29, %v357_v37  ;;  %v370_v42 = vadd.f32 %v668_v30, %v369_v38 }
  0x67   : > { %v382_v43 = vadd.f32 %v669_v31, %v381_v39  ;;  %v394_v44 = vadd.f32 %v670_v32, %v393_v40  ;;  %v671_v45 = vsel %vm401_vm5, 1.0, %v867_v0  ;;  %v672_v46 = vsel %vm413_vm6, 1.0, %v867_v0  ;;  %v404_v29 = vld [vmem:[%s976_s23 + $0x14] sm:$0x1]  ;;  %v416_v30 = vld [vmem:[%s976_s23 + $0x15] sm:$0x1] }
  0x68   : > { %v673_v47 = vsel %vm425_vm7, 1.0, %v867_v0  ;;  %v674_v48 = vsel %vm437_vm8, 1.0, %v867_v0  ;;  %v359_v49 = vrot.slane %v358_v41, 2  ;;  %v371_v50 = vrot.slane %v370_v42, 2  ;;  %v428_v33 = vld [vmem:[%s976_s23 + $0x16] sm:$0x1] }
  0x69   : > { %v383_v51 = vrot.slane %v382_v43, 2  ;;  %v395_v52 = vrot.slane %v394_v44, 2  ;;  %v405_v53 = vrot.slane %v671_v45, 4  ;;  %v417_v54 = vrot.slane %v672_v46, 4  ;;  %v440_v36 = vld [vmem:[%s976_s23 + $0x17] sm:$0x1] }
  0x6a   : > { %v429_v55 = vrot.slane %v673_v47, 4  ;;  %v441_v56 = vrot.slane %v674_v48, 4  ;;  %v360_v57 = vadd.f32 %v359_v49, %v358_v41  ;;  %v372_v58 = vadd.f32 %v371_v50, %v370_v42 }
  0x6b   : > { %v384_v59 = vadd.f32 %v383_v51, %v382_v43  ;;  %v396_v60 = vadd.f32 %v395_v52, %v394_v44  ;;  %v406_v63 = vadd.f32 %v671_v45, %v405_v53  ;;  %v418_v1 = vadd.f32 %v672_v46, %v417_v54 }
  0x6c   : > { %v430_v2 = vadd.f32 %v673_v47, %v429_v55  ;;  %v442_v3 = vadd.f32 %v674_v48, %v441_v56  ;;  %v361_v4 = vrot.slane %v360_v57, 1  ;;  %v373_v6 = vrot.slane %v372_v58, 1 }
  0x6d   : > { %v385_v10 = vrot.slane %v384_v59, 1  ;;  %v397_v11 = vrot.slane %v396_v60, 1  ;;  %v407_v13 = vrot.slane %v406_v63, 2  ;;  %v419_v14 = vrot.slane %v418_v1, 2 }
  0x6e   : > { %v431_v15 = vrot.slane %v430_v2, 2  ;;  %v443_v16 = vrot.slane %v442_v3, 2  ;;  %v362_v17 = vadd.f32 %v361_v4, %v360_v57  ;;  %v374_v18 = vadd.f32 %v373_v6, %v372_v58 }
  0x6f   : > { %v386_v19 = vadd.f32 %v385_v10, %v384_v59  ;;  %v398_v20 = vadd.f32 %v397_v11, %v396_v60  ;;  %v408_v21 = vadd.f32 %v407_v13, %v406_v63  ;;  %v420_v22 = vadd.f32 %v419_v14, %v418_v1 }
  0x70   : > { %v432_v23 = vadd.f32 %v431_v15, %v430_v2  ;;  %v444_v24 = vadd.f32 %v443_v16, %v442_v3  ;;  %v363_v25 = vadd.f32 %v362_v17, %v356_v61  ;;  %v375_v26 = vadd.f32 %v374_v18, %v368_v62  ;;  %v536_v2 = vld [vmem:[%s976_s23 + $0x1f] sm:$0x1] }
  0x71   : > { %v387_v27 = vadd.f32 %v386_v19, %v380_v9  ;;  %v399_v28 = vadd.f32 %v398_v20, %v392_v12  ;;  %v409_v31 = vrot.slane %v408_v21, 1  ;;  %v421_v32 = vrot.slane %v420_v22, 1  ;;  %v452_v12 = vld [vmem:[%s976_s23 + $0x18] sm:$0x1]  ;;  %v476_v19 = vld [vmem:[%s976_s23 + $0x1a] sm:$0x1] }
  0x72   : > { %v433_v34 = vrot.slane %v432_v23, 1  ;;  %v445_v35 = vrot.slane %v444_v24, 1  ;;  %364 = vst [vmem:[%s976_s23 + $0x10] sm:$0x1] %v363_v25  ;;  %376 = vst [vmem:[%s976_s23 + $0x11] sm:$0x1] %v375_v26  ;;  %v540_v53 = vadd.f32 %v539_v8, %v987_v5 }
  0x73   : > { %388 = vst [vmem:[%s976_s23 + $0x12] sm:$0x1] %v387_v27  ;;  %400 = vst [vmem:[%s976_s23 + $0x13] sm:$0x1] %v399_v28  ;;  %vm449_vm9 = vcmp.ge.f32.partialorder %v989_v7, 24.0  ;;  %vm461_vm10 = vcmp.ge.f32.partialorder %v989_v7, 25.0  ;;  %v410_v37 = vadd.f32 %v409_v31, %v408_v21  ;;  %v422_v38 = vadd.f32 %v421_v32, %v420_v22 }
  0x74   : > { %vm473_vm11 = vcmp.ge.f32.partialorder %v989_v7, 26.0  ;;  %vm485_vm12 = vcmp.ge.f32.partialorder %v989_v7, 27.0  ;;  %v434_v39 = vadd.f32 %v433_v34, %v432_v23  ;;  %v446_v40 = vadd.f32 %v445_v35, %v444_v24  ;;  %v488_v22 = vld [vmem:[%s976_s23 + $0x1b] sm:$0x1] }
  0x75   : > { %v675_v41 = vsel %vm449_vm9, 1.0, %v867_v0  ;;  %v676_v42 = vsel %vm461_vm10, 1.0, %v867_v0  ;;  %v677_v43 = vsel %vm473_vm11, 1.0, %v867_v0  ;;  %v678_v44 = vsel %vm485_vm12, 1.0, %v867_v0 }
  0x76   : > { %v411_v45 = vadd.f32 %v410_v37, %v404_v29  ;;  %v423_v46 = vadd.f32 %v422_v38, %v416_v30  ;;  %v435_v47 = vadd.f32 %v434_v39, %v428_v33  ;;  %v447_v48 = vadd.f32 %v446_v40, %v440_v36  ;;  %v500_v40 = vld [vmem:[%s976_s23 + $0x1c] sm:$0x1] }
  0x77   : > { %v453_v49 = vrot.slane %v675_v41, 4  ;;  %v465_v50 = vrot.slane %v676_v42, 4  ;;  %v477_v51 = vrot.slane %v677_v43, 4  ;;  %v489_v52 = vrot.slane %v678_v44, 4 }
  0x78   : > { %412 = vst [vmem:[%s976_s23 + $0x14] sm:$0x1] %v411_v45  ;;  %424 = vst [vmem:[%s976_s23 + $0x15] sm:$0x1] %v423_v46  ;;  %vm497_vm13 = vcmp.ge.f32.partialorder %v989_v7, 28.0  ;;  %vm509_vm14 = vcmp.ge.f32.partialorder %v989_v7, 29.0 }
  0x79   : > { %436 = vst [vmem:[%s976_s23 + $0x16] sm:$0x1] %v435_v47  ;;  %448 = vst [vmem:[%s976_s23 + $0x17] sm:$0x1] %v447_v48  ;;  %vm521_vm15 = vcmp.ge.f32.partialorder %v989_v7, 30.0  ;;  %v454_v54 = vadd.f32 %v675_v41, %v453_v49  ;;  %v466_v55 = vadd.f32 %v676_v42, %v465_v50  ;;  %v478_v56 = vadd.f32 %v677_v43, %v477_v51 }
  0x7a   : > { %v490_v57 = vadd.f32 %v678_v44, %v489_v52  ;;  %v679_v58 = vsel %vm497_vm13, 1.0, %v867_v0  ;;  %v680_v59 = vsel %vm509_vm14, 1.0, %v867_v0  ;;  %v681_v60 = vsel %vm521_vm15, 1.0, %v867_v0  ;;  %v464_v0 = vld [vmem:[%s976_s23 + $0x19] sm:$0x1] }
  0x7b   : > { %v541_v61 = vrot.slane %v540_v53, 1  ;;  %v455_v62 = vrot.slane %v454_v54, 2  ;;  %v467_v63 = vrot.slane %v466_v55, 2  ;;  %v479_v7 = vrot.slane %v478_v56, 2  ;;  %v512_v41 = vld [vmem:[%s976_s23 + $0x1d] sm:$0x1] }
  0x7c   : > { %v491_v1 = vrot.slane %v490_v57, 2  ;;  %v501_v3 = vrot.slane %v679_v58, 4  ;;  %v513_v5 = vrot.slane %v680_v59, 4  ;;  %v525_v8 = vrot.slane %v681_v60, 4  ;;  %v524_v42 = vld [vmem:[%s976_s23 + $0x1e] sm:$0x1] }
  0x7d   : > { %v542_v4 = vadd.f32 %v541_v61, %v540_v53  ;;  %v456_v6 = vadd.f32 %v455_v62, %v454_v54  ;;  %v468_v9 = vadd.f32 %v467_v63, %v466_v55  ;;  %v480_v10 = vadd.f32 %v479_v7, %v478_v56 }
  0x7e   : > { %v492_v11 = vadd.f32 %v491_v1, %v490_v57  ;;  %v502_v13 = vadd.f32 %v679_v58, %v501_v3  ;;  %v514_v14 = vadd.f32 %v680_v59, %v513_v5  ;;  %v526_v15 = vadd.f32 %v681_v60, %v525_v8 }
  0x7f   : > { %v543_v16 = vadd.f32 %v542_v4, %v536_v2  ;;  %v457_v17 = vrot.slane %v456_v6, 1  ;;  %v469_v18 = vrot.slane %v468_v9, 1  ;;  %v481_v20 = vrot.slane %v480_v10, 1 }
  0x80   : > { %v493_v21 = vrot.slane %v492_v11, 1  ;;  %v503_v23 = vrot.slane %v502_v13, 2  ;;  %v515_v24 = vrot.slane %v514_v14, 2  ;;  %v527_v25 = vrot.slane %v526_v15, 2 }
  0x81   : > { %544 = vst [vmem:[%s976_s23 + $0x1f] sm:$0x1] %v543_v16  ;;  %v458_v26 = vadd.f32 %v457_v17, %v456_v6  ;;  %v470_v27 = vadd.f32 %v469_v18, %v468_v9  ;;  %v482_v28 = vadd.f32 %v481_v20, %v480_v10 }
  0x82   : > { %v494_v29 = vadd.f32 %v493_v21, %v492_v11  ;;  %v504_v30 = vadd.f32 %v503_v23, %v502_v13  ;;  %v516_v31 = vadd.f32 %v515_v24, %v514_v14  ;;  %v528_v32 = vadd.f32 %v527_v25, %v526_v15 }
  0x83   : > { %v459_v33 = vadd.f32 %v458_v26, %v452_v12  ;;  %v471_v34 = vadd.f32 %v470_v27, %v464_v0  ;;  %v483_v35 = vadd.f32 %v482_v28, %v476_v19 }
  0x84   : > { %v495_v36 = vadd.f32 %v494_v29, %v488_v22  ;;  %v505_v37 = vrot.slane %v504_v30, 1  ;;  %v517_v38 = vrot.slane %v516_v31, 1  ;;  %v529_v39 = vrot.slane %v528_v32, 1 }
  0x85   : > { %460 = vst [vmem:[%s976_s23 + $0x18] sm:$0x1] %v459_v33  ;;  %472 = vst [vmem:[%s976_s23 + $0x19] sm:$0x1] %v471_v34 }
  0x86   : > { %484 = vst [vmem:[%s976_s23 + $0x1a] sm:$0x1] %v483_v35  ;;  %496 = vst [vmem:[%s976_s23 + $0x1b] sm:$0x1] %v495_v36  ;;  %v506_v43 = vadd.f32 %v505_v37, %v504_v30  ;;  %v518_v44 = vadd.f32 %v517_v38, %v516_v31  ;;  %v530_v45 = vadd.f32 %v529_v39, %v528_v32 }
  0x88   : > { %v507_v46 = vadd.f32 %v506_v43, %v500_v40  ;;  %v519_v47 = vadd.f32 %v518_v44, %v512_v41  ;;  %v531_v48 = vadd.f32 %v530_v45, %v524_v42 }
  0x8a   : > { %508 = vst [vmem:[%s976_s23 + $0x1c] sm:$0x1] %v507_v46  ;;  %520 = vst [vmem:[%s976_s23 + $0x1d] sm:$0x1] %v519_v47 }
  0x8b   : > { %532 = vst [vmem:[%s976_s23 + $0x1e] sm:$0x1] %v531_v48 }
  0x8c   : > { %797 = shalt.err (!%p794_p3)
}
  0x8d   : > { %s798_s3 = scalar_lea.hbm %s1123_s9, 512  ;;  %s802_s12 = scalar_lea.hbm %s1177_s1, 1024 }
  0x8e   : > { %p799_p5 = scmp.ne.s32.totalorder %s1123_s9, %s798_s3  ;;  %p803_p10 = scmp.lt.s32.totalorder %s1123_s9, %s1177_s1 }
  0x8f   : > { %p804_p4 = scmp.lt.s32.totalorder %s802_s12, %s798_s3 }
  0x90   : > { %p800_p6 = pnand %p799_p5, %p932_p9 }
  0x91   : > { %p805_p13 = por %p804_p4, %p803_p10 }
  0x92   : > { %p801_p7 = pneg %p800_p6 }
  0x94   : > { %p806_p8 = pnand %p805_p13, %p801_p7 }
  0x96   : > { %809 = shalt.err (!%p806_p8)
}
  0x97   : > { %s869_s17 = smov 128   ;;  %s870_s22 = smov 8  }
  0x98   : > { %691 = dma.vmem_to_hbm [thread:$0]  (%p932_p9), %s1125_s24, 512, %s1123_s9, %s546_s27, %s869_s17, %s869_s17, %s870_s22  }
  0x99 PF: > { %s574_s23 = sand.u32 1, %s844_s6   ;;  %p1183_p11 = scmp.ne.s32.totalorder %s1181_s21, 0 }
  0x9a   : > { %p1184_p12 = scmp.ge.s32.totalorder %s864_s11, 2  ;;  %s575_s18 = scalar_lea.sflag [#allocation4], %s574_s23 }
  0x9c   : > { %p698_p0 = pnand %p1184_p12, %p1183_p11 }
  0x9e   : > { %p699_p1 = pneg %p698_p0 }
  0xa0   : > { %839 = dma.done.wait (%p699_p1), %s575_s18, 512  }
  0xa1   : > { %841 = vsyncadd (%p699_p1), %s575_s18, 4294966784  ;;  %s17_s11 = sadd.s32 1, %s864_s11   ;;  %s1185_s6 = smov %s848_s7 }
  0xa2   : > { %p14_p2 = scmp.ge.s32.totalorder %s17_s11, 4   ;;  %s1186_s7 = smov %s852_s8 }
  0xa3   : > { %s1187_s8 = smov %s937_s20  ;;  %s1188_s9 = smov %s860_s10 }
  0xa4   : > { %s1189_s10 = smov %s1191_s14  ;;  %16 = sbr.rel (!%p14_p2) target bundleno = 6 (0x6), region = 73 }
  0xa9   :  { %580 = vsyncpa [#allocation3], 1 }
  0xaa   :  { %582 = vsyncpa [#allocation3 + $0x1], 1 }
  0xab   :  { %583 = vsyncpa [#allocation4], 1 }
  0xac   :  { %585 = vsyncpa [#allocation4 + $0x1], 1 }

</bundles_post_ra>
